<compile_context>
chip_gen: v5e
topology: v5e:2x2
jax: 0.10.0
libtpu: 0.0.40
codegen_flags: <defaults>
</compile_context>

<pallas_src>
import math

import jax
import jax.numpy as jnp
from jax.experimental import pallas as pl
from jax.experimental.pallas import tpu as pltpu


# ------------------------------ in-kernel math -------------------------------

_SQRT_2_OVER_PI = 0.7978845608028654


def _gelu_tanh(x):
    # tanh-approx GELU (== torch GELU(approximate='tanh')); ~6-7 VALU ops plus
    # one EUP tanh.  |err vs exact erf GELU| < ~3e-3, well inside the bf16-MXU
    # tolerance of this kernel.
    return 0.5 * x * (1.0 + jnp.tanh(_SQRT_2_OVER_PI * (x + 0.044715 * (x * x * x))))


# --------------------------------- kernels ------------------------------------

def ff_kernel_fused(x_ref, w1_ref, b1_ref, w2_ref, b2_ref, o_ref):
    """Grid = (token tiles, hidden tiles).  The f32 output tile itself is the
    reduction accumulator (its block index is constant across the k axis):
        o  = b2                                   (k == 0)
        o += GELU(x @ W1_k + b1_k) @ W2_k         (every k)
    """
    @pl.when(pl.program_id(1) == 0)
    def _init():
        o_ref[...] = jnp.broadcast_to(b2_ref[...], o_ref.shape)

    # (TM, D)bf16 @ (D, TH)bf16 -> (TM, TH) f32 on the MXU
    h = jnp.dot(x_ref[...], w1_ref[...], preferred_element_type=jnp.float32)
    h = _gelu_tanh(h + b1_ref[...])                       # f32 elementwise

    # (TM, TH)bf16 @ (TH, D)bf16 -> accumulate into the resident f32 output
    o_ref[...] += jnp.dot(h.astype(w2_ref.dtype), w2_ref[...],
                          preferred_element_type=jnp.float32)


def ff_kernel_scratch(x_ref, w1_ref, b1_ref, w2_ref, b2_ref, o_ref, acc_ref):
    """Same computation, but with an f32 VMEM scratch accumulator and a final
    cast -- used when the output dtype is not f32 (e.g. bf16 activations)."""
    k = pl.program_id(1)

    @pl.when(k == 0)
    def _init():
        acc_ref[...] = jnp.broadcast_to(b2_ref[...], acc_ref.shape)

    h = jnp.dot(x_ref[...], w1_ref[...], preferred_element_type=jnp.float32)
    h = _gelu_tanh(h + b1_ref[...])
    acc_ref[...] += jnp.dot(h.astype(w2_ref.dtype), w2_ref[...],
                            preferred_element_type=jnp.float32)

    @pl.when(k == pl.num_programs(1) - 1)
    def _finalize():
        o_ref[...] = acc_ref[...].astype(o_ref.dtype)


# -------------------------------- wrapper -------------------------------------

def _round_up(x, m):
    return (x + m - 1) // m * m


def _vmem_limit_bytes():
    """Per-generation VMEM budget: ~112 MiB on v5e/v6e (128 MiB physical),
    ~56 MiB on v7x (64 MiB physical), with headroom for internal scratch."""
    cap = 64 * 1024 * 1024
    try:
        cap = int(pltpu.get_tpu_info().vmem_capacity_bytes)
    except Exception:
        pass
    return min(cap * 7 // 8, 112 * 1024 * 1024)


def _choose_th(h_pad, d_pad, tm, budget, cdt_bytes=2, acc_bytes=4):
    """Largest multiple of 128 dividing h_pad whose working set fits `budget`.
    th == h_pad makes the weight block indices constant over the whole grid,
    so W1/W2 are DMA'd once and stay VMEM-resident."""
    def fits(th):
        weights = 2 * d_pad * th * cdt_bytes * 2                 # W1+W2, double-buffered
        acts = tm * d_pad * (cdt_bytes * 2 + acc_bytes * 2)      # x + out tiles
        acc = tm * d_pad * acc_bytes                              # optional f32 scratch
        inter = tm * th * acc_bytes                               # GELU intermediate
        bias = (th + d_pad) * acc_bytes * 2
        return weights + acts + acc + inter + bias <= budget

    th = h_pad
    while th >= 128:
        if h_pad % th == 0 and fits(th):
            return th
        th -= 128
    return 128


def feedforward(x, w1, b1, w2, b2, *, tm_target=512, compute_dtype=jnp.bfloat16):
    """y = GELU(x @ w1 + b1) @ w2 + b2 for x of shape (..., D).

    Weights should be pre-cast to `compute_dtype` (bf16) once at init; biases
    may be any float dtype (promoted to f32). Output dtype == x.dtype."""
    orig_shape = x.shape
    out_dtype = x.dtype
    D = orig_shape[-1]
    H = w1.shape[1]
    M = math.prod(orig_shape[:-1])

    d_pad = _round_up(D, 128)          # lane-dense loads/stores
    h_pad = _round_up(H, 128)

    x2 = x.reshape(M, D)

    # ----- token-axis tile: multiple of 8 sublanes, large for arithmetic
    # intensity, but keep grid[0] >= 2 so both v7x TensorCores get work.
    m8 = _round_up(max(M, 8), 8)
    tm = min(tm_target, m8)
    if m8 // tm < 2 and m8 >= 16:
        tm = max(8, _round_up(m8 // 2, 8))
    m_pad = _round_up(m8, tm)

    # ----- VMEM budget and hidden (reduction) tile
    vmem_limit = _vmem_limit_bytes()
    th = _choose_th(h_pad, d_pad, tm, budget=int(vmem_limit * 0.8))

    # ----- padding (zeros are exact: GELU(0)=0 and zero weight rows/cols
    # contribute nothing; padded token rows are sliced off afterwards).
    if m_pad != M or d_pad != D:
        x2 = jnp.pad(x2, ((0, m_pad - M), (0, d_pad - D)))
    w1p = jnp.pad(w1, ((0, d_pad - D), (0, h_pad - H))) if (d_pad != D or h_pad != H) else w1
    w2p = jnp.pad(w2, ((0, h_pad - H), (0, d_pad - D))) if (d_pad != D or h_pad != H) else w2
    b1p = (jnp.pad(b1, (0, h_pad - H)) if h_pad != H else b1).reshape(1, h_pad).astype(jnp.float32)
    b2p = (jnp.pad(b2, (0, d_pad - D)) if d_pad != D else b2).reshape(1, d_pad).astype(jnp.float32)

    # MXU inputs in compute dtype (no-op when weights are already bf16).
    x_c = x2 if x2.dtype == compute_dtype else x2.astype(compute_dtype)
    w1_c = w1p if w1p.dtype == compute_dtype else w1p.astype(compute_dtype)
    w2_c = w2p if w2p.dtype == compute_dtype else w2p.astype(compute_dtype)

    grid = (m_pad // tm, h_pad // th)

    # f32 outputs accumulate directly in the output block; other dtypes keep
    # an f32 scratch accumulator and cast once in the finalize step.
    fuse_acc = (out_dtype == jnp.float32)
    kernel = ff_kernel_fused if fuse_acc else ff_kernel_scratch
    scratch = [] if fuse_acc else [pltpu.VMEM((tm, d_pad), jnp.float32)]

    out = pl.pallas_call(
        kernel,
        out_shape=jax.ShapeDtypeStruct((m_pad, d_pad), out_dtype),
        grid_spec=pltpu.PrefetchScalarGridSpec(
            num_scalar_prefetch=0,
            grid=grid,
            in_specs=[
                pl.BlockSpec((tm, d_pad), lambda i, k: (i, 0)),   # x tile
                pl.BlockSpec((d_pad, th), lambda i, k: (0, k)),   # W1 tile
                pl.BlockSpec((1, th), lambda i, k: (0, k)),       # b1 tile
                pl.BlockSpec((th, d_pad), lambda i, k: (k, 0)),   # W2 tile
                pl.BlockSpec((1, d_pad), lambda i, k: (0, 0)),    # b2 (resident)
            ],
            out_specs=pl.BlockSpec((tm, d_pad), lambda i, k: (i, 0)),
            scratch_shapes=scratch,
        ),
        compiler_params=pltpu.CompilerParams(
            dimension_semantics=("parallel", "arbitrary"),
            vmem_limit_bytes=vmem_limit,
        ),
    )(x_c, w1_c, b1p, w2_c, b2p)

    return out[:M, :D].reshape(orig_shape)


# ----------------------------- pure-JAX reference ----------------------------

def reference_feedforward(x, w1, b1, w2, b2):
    h = jax.nn.gelu(x @ w1 + b1.reshape(1, -1), approximate=False)
    return h @ w2 + b2.reshape(1, -1)


# ----------------------------------- main -------------------------------------

if __name__ == "__main__":
    B, N, dim, hidden_dim = 2, 8, 128, 512

    key = jax.random.PRNGKey(0)
    kx, k1, k2, k3, k4 = jax.random.split(key, 5)
    x = jax.random.normal(kx, (B, N, dim), jnp.float32)
    w1 = 0.05 * jax.random.normal(k1, (dim, hidden_dim), jnp.float32)
    b1 = 0.02 * jax.random.normal(k2, (hidden_dim,), jnp.float32)
    w2 = 0.05 * jax.random.normal(k3, (hidden_dim, dim), jnp.float32)
    b2 = 0.02 * jax.random.normal(k4, (dim,), jnp.float32)

    # Store the weights in the MXU compute dtype once (avoids a per-forward
    # f32->bf16 cast pass over W1/W2 inside the wrapper).
    w1_bf = w1.astype(jnp.bfloat16)
    w2_bf = w2.astype(jnp.bfloat16)

    # TODO(synk): nn.Dropout(p=0.0) is the identity; nonzero dropout would need
    # pltpu.prng_seed / stateful_bernoulli masking and is intentionally omitted.
    out = feedforward(x, w1_bf, b1, w2_bf, b2)
    out = jax.block_until_ready(out)

    with jax.default_matmul_precision("highest"):
        ref = reference_feedforward(x, w1, b1, w2, b2)
    ref = jax.block_until_ready(ref)

    assert out.shape == x.shape and out.dtype == x.dtype
    max_err = float(jnp.max(jnp.abs(out - ref)))
    # bf16 MXU inputs (f32 accumulation) + tanh-approx GELU -> loose tolerance
    assert jnp.allclose(out, ref, atol=3e-2, rtol=3e-2), max_err
    print("KERNEL_OK")
</pallas_src>

<mosaic_0001>
module attributes {stable_mosaic.version = 11 : i64} {
  func.func @ff_kernel_fused(%arg0: i32, %arg1: i32, %arg2: memref<8x128xbf16, #tpu.memory_space<vmem>>, %arg3: memref<128x512xbf16, #tpu.memory_space<vmem>>, %arg4: memref<1x512xf32, #tpu.memory_space<vmem>>, %arg5: memref<512x128xbf16, #tpu.memory_space<vmem>>, %arg6: memref<1x128xf32, #tpu.memory_space<vmem>>, %arg7: memref<8x128xf32, #tpu.memory_space<vmem>>) attributes {dimension_semantics = [#tpu.dimension_semantics<parallel>, #tpu.dimension_semantics<arbitrary>], iteration_bounds = array<i64: 2, 1>, scalar_prefetch = 0 : i64, scratch_operands = 0 : i64, tpu.core_type = #tpu.core_type<tc>, window_params = [{transform_indices = @transform_0, window_bounds = array<i64: 8, 128>}, {transform_indices = @transform_1, window_bounds = array<i64: 128, 512>}, {transform_indices = @transform_2, window_bounds = array<i64: 1, 512>}, {transform_indices = @transform_3, window_bounds = array<i64: 512, 128>}, {pipeline_mode = #tpu.pipeline_mode<synchronous>, transform_indices = @transform_4, window_bounds = array<i64: 1, 128>}, {transform_indices = @transform_5, window_bounds = array<i64: 8, 128>}]} {
    %c0_i32 = arith.constant 0 : i32
    %0 = arith.cmpi eq, %arg1, %c0_i32 : i32
    %1 = arith.extui %0 : i1 to i32
    %c0_i32_0 = arith.constant 0 : i32
    %2 = arith.cmpi ne, %1, %c0_i32_0 : i32
    scf.if %2 {
      %c0_17 = arith.constant 0 : index
      %c0_18 = arith.constant 0 : index
      %28 = vector.load %arg6[%c0_17, %c0_18] : memref<1x128xf32, #tpu.memory_space<vmem>>, vector<1x128xf32>
      %29 = vector.shape_cast %28 : vector<1x128xf32> to vector<1x128xf32>
      %30 = vector.broadcast %29 : vector<1x128xf32> to vector<8x128xf32>
      %c0_19 = arith.constant 0 : index
      %c0_20 = arith.constant 0 : index
      %31 = vector.load %arg7[%c0_19, %c0_20] : memref<8x128xf32, #tpu.memory_space<vmem>>, vector<8x128xf32>
      tpu.vector_store %arg7[%c0_19, %c0_20], %30 {strides = array<i32>} : memref<8x128xf32, #tpu.memory_space<vmem>>, vector<8x128xf32>,
    } else {
    }
    %c0 = arith.constant 0 : index
    %c0_1 = arith.constant 0 : index
    %3 = vector.load %arg2[%c0, %c0_1] : memref<8x128xbf16, #tpu.memory_space<vmem>>, vector<8x128xbf16>
    %c0_2 = arith.constant 0 : index
    %c0_3 = arith.constant 0 : index
    %4 = vector.load %arg3[%c0_2, %c0_3] : memref<128x512xbf16, #tpu.memory_space<vmem>>, vector<128x512xbf16>
    %cst = arith.constant dense<0.000000e+00> : vector<8x512xf32>
    %5 = tpu.matmul %3, %4, %cst {dimension_numbers = #tpu.dot_dimension_numbers<[1], [0], [0], [1], [0, 0, 1, 1], [], []>} : vector<8x128xbf16>, vector<128x512xbf16>, vector<8x512xf32> -> vector<8x512xf32>
    %c0_4 = arith.constant 0 : index
    %c0_5 = arith.constant 0 : index
    %6 = vector.load %arg4[%c0_4, %c0_5] : memref<1x512xf32, #tpu.memory_space<vmem>>, vector<1x512xf32>
    %7 = vector.broadcast %6 : vector<1x512xf32> to vector<8x512xf32>
    %8 = arith.addf %5, %7 : vector<8x512xf32>
    %cst_6 = arith.constant 5.000000e-01 : f32
    %9 = vector.broadcast %cst_6 : f32 to vector<8x512xf32>
    %10 = arith.mulf %9, %8 : vector<8x512xf32>
    %11 = arith.mulf %8, %8 : vector<8x512xf32>
    %12 = arith.mulf %11, %8 : vector<8x512xf32>
    %cst_7 = arith.constant 4.471500e-02 : f32
    %13 = vector.broadcast %cst_7 : f32 to vector<8x512xf32>
    %14 = arith.mulf %13, %12 : vector<8x512xf32>
    %15 = arith.addf %8, %14 : vector<8x512xf32>
    %cst_8 = arith.constant 0.797884583 : f32
    %16 = vector.broadcast %cst_8 : f32 to vector<8x512xf32>
    %17 = arith.mulf %16, %15 : vector<8x512xf32>
    %18 = math.tanh %17 : vector<8x512xf32>
    %cst_9 = arith.constant 1.000000e+00 : f32
    %19 = vector.broadcast %cst_9 : f32 to vector<8x512xf32>
    %20 = arith.addf %19, %18 : vector<8x512xf32>
    %21 = arith.mulf %10, %20 : vector<8x512xf32>
    %c0_10 = arith.constant 0 : index
    %c0_11 = arith.constant 0 : index
    %22 = vector.load %arg7[%c0_10, %c0_11] : memref<8x128xf32, #tpu.memory_space<vmem>>, vector<8x128xf32>
    %23 = arith.truncf %21 : vector<8x512xf32> to vector<8x512xbf16>
    %c0_12 = arith.constant 0 : index
    %c0_13 = arith.constant 0 : index
    %24 = vector.load %arg5[%c0_12, %c0_13] : memref<512x128xbf16, #tpu.memory_space<vmem>>, vector<512x128xbf16>
    %cst_14 = arith.constant dense<0.000000e+00> : vector<8x128xf32>
    %25 = tpu.matmul %23, %24, %cst_14 {dimension_numbers = #tpu.dot_dimension_numbers<[1], [0], [0], [1], [0, 0, 1, 1], [], []>} : vector<8x512xbf16>, vector<512x128xbf16>, vector<8x128xf32> -> vector<8x128xf32>
    %26 = arith.addf %22, %25 : vector<8x128xf32>
    %c0_15 = arith.constant 0 : index
    %c0_16 = arith.constant 0 : index
    %27 = vector.load %arg7[%c0_15, %c0_16] : memref<8x128xf32, #tpu.memory_space<vmem>>, vector<8x128xf32>
    tpu.vector_store %arg7[%c0_15, %c0_16], %26 {strides = array<i32>} : memref<8x128xf32, #tpu.memory_space<vmem>>, vector<8x128xf32>,
    return
  }
  func.func @transform_0(%arg0: i32, %arg1: i32) -> (i32, i32) {
    %c0_i32 = arith.constant 0 : i32
    %c0_i32_0 = arith.constant 0 : i32
    return %arg0, %c0_i32 : i32, i32
  }
  func.func @transform_1(%arg0: i32, %arg1: i32) -> (i32, i32) {
    %c0_i32 = arith.constant 0 : i32
    %c0_i32_0 = arith.constant 0 : i32
    return %c0_i32, %arg1 : i32, i32
  }
  func.func @transform_2(%arg0: i32, %arg1: i32) -> (i32, i32) {
    %c0_i32 = arith.constant 0 : i32
    %c0_i32_0 = arith.constant 0 : i32
    return %c0_i32, %arg1 : i32, i32
  }
  func.func @transform_3(%arg0: i32, %arg1: i32) -> (i32, i32) {
    %c0_i32 = arith.constant 0 : i32
    %c0_i32_0 = arith.constant 0 : i32
    return %arg1, %c0_i32 : i32, i32
  }
  func.func @transform_4(%arg0: i32, %arg1: i32) -> (i32, i32) {
    %c0_i32 = arith.constant 0 : i32
    %c0_i32_0 = arith.constant 0 : i32
    %c0_i32_1 = arith.constant 0 : i32
    return %c0_i32, %c0_i32_0 : i32, i32
  }
  func.func @transform_5(%arg0: i32, %arg1: i32) -> (i32, i32) {
    %c0_i32 = arith.constant 0 : i32
    %c0_i32_0 = arith.constant 0 : i32
    return %arg0, %c0_i32 : i32, i32
  }
}

</mosaic_0001>

<bundles_post_ra>
// kernel: tpu_custom_call.1
= control target key start
LH: loop header
LB: loop body
LE: loop exit
PB: predicated region body
PF: predicated region fallthrough
CT: control target
= control target key end

     0   :  { %10 = vsyncpa [#allocation3], 0  ;;  %s1940_s0 = inlined_call_operand.hbm [shape: bf16[16,128], index: 0, kind: input, shape index: {}]   ;;  %s1941_s1 = inlined_call_operand.hbm [shape: bf16[128,512], index: 1, kind: input, shape index: {}]   ;;  %s1942_s2 = inlined_call_operand.hbm [shape: f32[1,512], index: 2, kind: input, shape index: {}]   ;;  %s1943_s3 = inlined_call_operand.hbm [shape: bf16[512,128], index: 3, kind: input, shape index: {}]   ;;  %s1944_s4 = inlined_call_operand.vmem [shape: f32[1,128], index: 4, kind: input, shape index: {}]   ;;  %s1945_s5 = inlined_call_operand.hbm [shape: f32[16,128], index: 5, kind: output, shape index: {}]  }
   0x1   :  { %12 = vsyncpa [#allocation3 + $0x1], 0 }
   0x2   :  { %13 = vsyncpa [#allocation6], 0 }
   0x3   :  { %14 = vsyncpa [#allocation9], 0 }
   0x4   :  { %15 = vsyncpa [#allocation4], 0 }
   0x5   :  { %17 = vsyncpa [#allocation4 + $0x1], 0  ;;  %s1766_s18 = smov 0   ;;  %s1768_s19 = smov 0  }
   0x6   :  { %s1770_s20 = smov 0   ;;  %s1772_s21 = smov 0  }
   0x7   :  { %s1774_s22 = smov 0   ;;  %s1776_s23 = smov 0  }
   0x8 LB: > { %s1072_s24 = sadd.s32 4294967295, %s1727_s23   ;;  %p1074_p0 = scmp.ge.s32.totalorder %s1727_s23, 1  ;;  %s1727_s23 = sphi %s1776_s23, %s23_s23   ;;  %s1723_s22 = sphi %s1774_s22, %s1957_s22   ;;  %s1719_s21 = sphi %s1772_s21, %s1956_s21   ;;  %s1715_s20 = sphi %s1770_s20, %s1955_s20   ;;  %s1711_s19 = sphi %s1768_s19, %s1954_s19   ;;  %s1707_s18 = sphi %s1766_s18, %s1953_s18  }
   0x9   : > { %p1800_p1 = scmp.eq.s32.totalorder %s1072_s24, 0  ;;  %p191_p2 = scmp.lt.s32.totalorder %s1727_s23, 3 }
   0xa   : > { %s205_s28 = sshll.u32 %s1941_s1, 4  ;;  %s1729_s30 = smov [#allocation5]   ;;  %s206_s28 = int_to_ptr.hbm [resolvable:$true] %s205_s28 }
   0xb   : > { %p1808_p3 = pnand %p1074_p0, %p191_p2  ;;  %s207_s6 = sshll.u32 %s1729_s30, 4  ;;  %s208_s6 = int_to_ptr.vmem [resolvable:$true] %s207_s6 }
   0xc   : > { %p1078_p6 = scmp.ge.s32.totalorder %s1727_s23, 2  ;;  %s222_s10 = sshll.u32 %s1942_s2, 4  ;;  %s223_s10 = int_to_ptr.hbm [resolvable:$true] %s222_s10 }
   0xd   : > { %p1427_p4 = pneg %p1808_p3  ;;  %s1730_s11 = smov 256  }
   0xe   : > { %s1731_s12 = smov 16   ;;  %s1732_s13 = smov [#allocation7]  }
   0xf   : > { %p1816_p5 = pnand %p1427_p4, %p1800_p1  ;;  %s224_s14 = sshll.u32 %s1732_s13, 4  ;;  %s225_s14 = int_to_ptr.vmem [resolvable:$true] %s224_s14 }
  0x10   : > { %s236_s17 = sshll.u32 %s1943_s3, 4  ;;  %s1733_s26 = smov [#allocation8]   ;;  %s237_s17 = int_to_ptr.hbm [resolvable:$true] %s236_s17 }
  0x11   : > { %1430 = dma.hbm_to_vmem [thread:$0]  (!%p1816_p5), %s206_s28, 4096, %s208_s6, [#allocation6], %s1730_s11, %s1730_s11, %s1731_s12  }
  0x12   : > { %1433 = dma.hbm_to_vmem [thread:$0]  (!%p1816_p5), %s223_s10, 64, %s225_s14, [#allocation6]  }
  0x13   : > { %s238_s27 = sshll.u32 %s1733_s26, 4  ;;  %s1734_s28 = smov 64   ;;  %s239_s27 = int_to_ptr.vmem [resolvable:$true] %s238_s27 }
  0x14   : > { %s1735_s30 = smov 4   ;;  %s1073_s6 = sadd.s32 4294967294, %s1727_s23  }
  0x15   : > { %1436 = dma.hbm_to_vmem [thread:$0]  (!%p1816_p5), %s237_s17, 4096, %s239_s27, [#allocation9], %s1734_s28, %s1734_s28, %s1735_s30  }
  0x16   : > { %s35_s8 = sadd.s32 1, %s1723_s22  ;;  %s42_s9 = sadd.s32 1, %s1715_s20 }
  0x17   : > { %p37_p7 = scmp.ge.s32.totalorder %s35_s8, 2  ;;  %p49_p8 = scmp.ne.s32.totalorder %s1715_s20, %s1711_s19 }
  0x18   : > { %p50_p9 = scmp.eq.s32.totalorder %s1727_s23, 0  ;;  %p55_p10 = scmp.ne.s32.totalorder %s1711_s19, %s1707_s18 }
  0x19   : > { %s1959_s8 = smov (%p37_p7, %s35_s8), 0  ;;  %p178_p13 = scmp.eq.s32.totalorder %s1072_s24, 1 }
  0x1a   : > { %p1843_p11 = por %p50_p9, %p49_p8  ;;  %p1849_p12 = por %p1800_p1, %p55_p10 }
  0x1b   : > { %s39_s11 = ssub.s32 %s1723_s22, %s1959_s8  ;;  %p184_p2 = scmp.eq.s32.totalorder %s1073_s6, 1 }
  0x1c   : > { %p40_p0 = scmp.eq.s32.totalorder %s39_s11, 0  ;;  %p1857_p4 = por %p178_p13, %p49_p8 }
  0x1d   : > { %p1448_p5 = scmp.lt.s32.totalorder %s1727_s23, 2  ;;  %p1865_p7 = por %p184_p2, %p55_p10 }
  0x1e   : > { %s1863_s13 = scalar_select %p40_p0, %s1715_s20, %s42_s9  }
  0x1f   : > { %s255_s15 = sand.u32 1, %s1715_s20   ;;  %s1080_s17 = sshll.u32 %s1723_s22, 2 }
  0x20   : > { %s1079_s16 = sshll.u32 %s255_s15, 2  ;;  %s263_s24 = scalar_lea.hbm %s1940_s0, %s1080_s17 }
  0x21   : > { %s259_s28 = scalar_lea.vmem [#allocation2], %s1079_s16  ;;  %s265_s6 = sshll.u32 %s263_s24, 4  ;;  %s266_s6 = int_to_ptr.hbm [resolvable:$true] %s265_s6 }
  0x22   : > { %s267_s30 = sshll.u32 %s259_s28, 4  ;;  %p1438_p8 = pnand %p1448_p5, %p1843_p11  ;;  %s268_s30 = int_to_ptr.vmem [resolvable:$true] %s267_s30 }
  0x23   : > { %s256_s9 = scalar_lea.sflag [#allocation3], %s255_s15  ;;  %276 = sbr.rel (%p1808_p3) target bundleno = 380 (0x17c), region = 40 }
  0x24   : > { %1440 = dma.hbm_to_vmem [thread:$0]  (!%p1438_p8), %s266_s6, 64, %s268_s30, %s256_s9  }
  0x25   : > { %s1879_s11 = sand.u32 (!%p1808_p3), 1, %s1711_s19  }
  0x26   : > { %s1082_s26 = sshll.u32 (!%p1808_p3), %s1879_s11, 2  ;;  %s279_s17 = scalar_lea.sflag (!%p1808_p3), [#allocation3], %s1879_s11 }
  0x27   : > { %s1883_s16 = scalar_lea.vmem (!%p1808_p3), [#allocation2], %s1082_s26 }
  0x28   : > { %1690 = dma.done.wait (%p1849_p12), %s279_s17, 64  }
  0x29   : > { %1692 = vsyncadd (%p1849_p12), %s279_s17, 4294967232 }
  0x2a   : > { %1694 = dma.done.wait (%p1800_p1), [#allocation6], 4160  }
  0x2b   : > { %1696 = vsyncadd (%p1800_p1), [#allocation6], 4294963136 }
  0x2c   : > { %1698 = dma.done.wait (%p1800_p1), [#allocation9], 4096  }
  0x2d   : > { %1700 = vsyncadd (%p1800_p1), [#allocation9], 4294963200  ;;  %v1201_v0 = vld [vmem:[#allocation5 + $0xe0] sm:$0xf]  ;;  %v1377_v1 = vld [vmem:[#allocation5 + $0xec] sm:$0xf0] }
  0x2e   : > { %v1375_v2 = vld [vmem:[#allocation5 + $0xe4] sm:$0xf]  ;;  %v1202_v3 = vor.u32 %v1377_v1, %v1201_v0  ;;  %v1203_v4 = vld [vmem:[#allocation5 + $0xf0] sm:$0xf0]  ;;  %v1209_v5 = vld [vmem:[#allocation5 + $0xe8] sm:$0xf] }
  0x2f   : > { %v1378_v6 = vld [vmem:[#allocation5 + $0xf4] sm:$0xf0]  ;;  %v1206_v7 = vor.u32 %v1375_v2, %v1203_v4  ;;  %v1376_v9 = vld [vmem:[#allocation5 + $0xec] sm:$0xf]  ;;  %v1211_v10 = vld [vmem:[#allocation5 + $0xf8] sm:$0xf0] }
  0x30   : > { %v1210_v8 = vor.u32 %v1378_v6, %v1209_v5  ;;  %v1185_v11 = vld [vmem:[#allocation5 + $0xc0] sm:$0xf]  ;;  %540 = vmatpush.bf16.msra.mxu0 %v1202_v3  ;;  %v1214_v12 = vor.u32 %v1376_v9, %v1211_v10  ;;  %v1373_v13 = vld [vmem:[#allocation5 + $0xcc] sm:$0xf0]  ;;  %v1371_v14 = vld [vmem:[#allocation5 + $0xc4] sm:$0xf] }
  0x31   : > { %v1187_v15 = vld [vmem:[#allocation5 + $0xd0] sm:$0xf0]  ;;  %553 = vmatpush.bf16.msra.mxu1 %v1206_v7  ;;  %v1186_v16 = vor.u32 %v1373_v13, %v1185_v11  ;;  %v1193_v18 = vld [vmem:[#allocation5 + $0xc8] sm:$0xf]  ;;  %v1374_v19 = vld [vmem:[#allocation5 + $0xd4] sm:$0xf0] }
  0x32   : > { %566 = vmatpush.bf16.msra.mxu2 %v1210_v8  ;;  %v1190_v17 = vor.u32 %v1371_v14, %v1187_v15  ;;  %v1372_v20 = vld [vmem:[#allocation5 + $0xcc] sm:$0xf]  ;;  %579 = vmatpush.bf16.msra.mxu3 %v1214_v12  ;;  %v1194_v21 = vor.u32 %v1374_v19, %v1193_v18  ;;  %v1195_v22 = vld [vmem:[#allocation5 + $0xd8] sm:$0xf0]  ;;  %v1169_v23 = vld [vmem:[#allocation5 + $0xa0] sm:$0xf] }
  0x33   : > { %v1369_v24 = vld [vmem:[#allocation5 + $0xac] sm:$0xf0]  ;;  %v1198_v25 = vor.u32 %v1372_v20, %v1195_v22  ;;  %v1367_v26 = vld [vmem:[#allocation5 + $0xa4] sm:$0xf]  ;;  %v1171_v27 = vld [vmem:[#allocation5 + $0xb0] sm:$0xf0] }
  0x34   : > { %v1177_v28 = vld [vmem:[#allocation5 + $0xa8] sm:$0xf]  ;;  %541 = vmatpush.bf16.msra.mxu0 %v1186_v16  ;;  %v1170_v29 = vor.u32 %v1369_v24, %v1169_v23  ;;  %v1370_v30 = vld [vmem:[#allocation5 + $0xb4] sm:$0xf0]  ;;  %v1368_v31 = vld [vmem:[#allocation5 + $0xac] sm:$0xf]  ;;  %v1174_v33 = vor.u32 %v1367_v26, %v1171_v27 }
  0x35   : > { %v1179_v32 = vld [vmem:[#allocation5 + $0xb8] sm:$0xf0]  ;;  %554 = vmatpush.bf16.msra.mxu1 %v1190_v17  ;;  %v1178_v34 = vor.u32 %v1370_v30, %v1177_v28  ;;  %v1153_v35 = vld [vmem:[#allocation5 + $0x80] sm:$0xf]  ;;  %v1365_v36 = vld [vmem:[#allocation5 + $0x8c] sm:$0xf0] }
  0x36   : > { %567 = vmatpush.bf16.msra.mxu2 %v1194_v21  ;;  %v1363_v37 = vld [vmem:[#allocation5 + $0x84] sm:$0xf]  ;;  %580 = vmatpush.bf16.msra.mxu3 %v1198_v25  ;;  %v1182_v38 = vor.u32 %v1368_v31, %v1179_v32  ;;  %v1155_v39 = vld [vmem:[#allocation5 + $0x90] sm:$0xf0]  ;;  %v1161_v40 = vld [vmem:[#allocation5 + $0x88] sm:$0xf]  ;;  %v1154_v44 = vor.u32 %v1365_v36, %v1153_v35 }
  0x37   : > { %v1366_v41 = vld [vmem:[#allocation5 + $0x94] sm:$0xf0]  ;;  %v1364_v42 = vld [vmem:[#allocation5 + $0x8c] sm:$0xf]  ;;  %v1163_v43 = vld [vmem:[#allocation5 + $0x98] sm:$0xf0]  ;;  %v1158_v45 = vor.u32 %v1363_v37, %v1155_v39 }
  0x38   : > { %542 = vmatpush.bf16.msra.mxu0 %v1170_v29  ;;  %v1162_v46 = vor.u32 %v1366_v41, %v1161_v40  ;;  %v1137_v47 = vld [vmem:[#allocation5 + $0x60] sm:$0xf]  ;;  %v1361_v48 = vld [vmem:[#allocation5 + $0x6c] sm:$0xf0]  ;;  %v1359_v49 = vld [vmem:[#allocation5 + $0x64] sm:$0xf]  ;;  %v1166_v50 = vor.u32 %v1364_v42, %v1163_v43 }
  0x39   : > { %555 = vmatpush.bf16.msra.mxu1 %v1174_v33  ;;  %v1139_v51 = vld [vmem:[#allocation5 + $0x70] sm:$0xf0]  ;;  %v1145_v52 = vld [vmem:[#allocation5 + $0x68] sm:$0xf]  ;;  %v1362_v53 = vld [vmem:[#allocation5 + $0x74] sm:$0xf0]  ;;  %v1138_v56 = vor.u32 %v1361_v48, %v1137_v47 }
  0x3a   : > { %568 = vmatpush.bf16.msra.mxu2 %v1178_v34  ;;  %581 = vmatpush.bf16.msra.mxu3 %v1182_v38  ;;  %v1360_v54 = vld [vmem:[#allocation5 + $0x6c] sm:$0xf]  ;;  %v1147_v55 = vld [vmem:[#allocation5 + $0x78] sm:$0xf0]  ;;  %v1142_v57 = vor.u32 %v1359_v49, %v1139_v51  ;;  %v1146_v58 = vor.u32 %v1362_v53, %v1145_v52  ;;  %v1121_v59 = vld [vmem:[#allocation5 + $0x40] sm:$0xf] }
  0x3b   : > { %v1357_v60 = vld [vmem:[#allocation5 + $0x4c] sm:$0xf0]  ;;  %v1355_v61 = vld [vmem:[#allocation5 + $0x44] sm:$0xf]  ;;  %v1150_v62 = vor.u32 %v1360_v54, %v1147_v55  ;;  %v1123_v63 = vld [vmem:[#allocation5 + $0x50] sm:$0xf0] }
  0x3c   : > { %543 = vmatpush.bf16.msra.mxu0 %v1154_v44  ;;  %v1129_v0 = vld [vmem:[#allocation5 + $0x48] sm:$0xf]  ;;  %v1358_v1 = vld [vmem:[#allocation5 + $0x54] sm:$0xf0]  ;;  %v1356_v2 = vld [vmem:[#allocation5 + $0x4c] sm:$0xf]  ;;  %v1122_v4 = vor.u32 %v1357_v60, %v1121_v59  ;;  %v1126_v5 = vor.u32 %v1355_v61, %v1123_v63 }
  0x3d   : > { %556 = vmatpush.bf16.msra.mxu1 %v1158_v45  ;;  %v1131_v3 = vld [vmem:[#allocation5 + $0x58] sm:$0xf0]  ;;  %v1130_v6 = vor.u32 %v1358_v1, %v1129_v0  ;;  %v1105_v7 = vld [vmem:[#allocation5 + $0x20] sm:$0xf]  ;;  %v1353_v8 = vld [vmem:[#allocation5 + $0x2c] sm:$0xf0] }
  0x3e   : > { %569 = vmatpush.bf16.msra.mxu2 %v1162_v46  ;;  %582 = vmatpush.bf16.msra.mxu3 %v1166_v50  ;;  %v1351_v9 = vld [vmem:[#allocation5 + $0x24] sm:$0xf]  ;;  %v1134_v10 = vor.u32 %v1356_v2, %v1131_v3  ;;  %v1107_v11 = vld [vmem:[#allocation5 + $0x30] sm:$0xf0]  ;;  %v1113_v12 = vld [vmem:[#allocation5 + $0x28] sm:$0xf]  ;;  %v1106_v16 = vor.u32 %v1353_v8, %v1105_v7 }
  0x3f   : > { %v1354_v13 = vld [vmem:[#allocation5 + $0x34] sm:$0xf0]  ;;  %v1352_v14 = vld [vmem:[#allocation5 + $0x2c] sm:$0xf]  ;;  %v1115_v15 = vld [vmem:[#allocation5 + $0x38] sm:$0xf0]  ;;  %v1110_v17 = vor.u32 %v1351_v9, %v1107_v11 }
  0x40   : > { %544 = vmatpush.bf16.msra.mxu0 %v1138_v56  ;;  %v1114_v18 = vor.u32 %v1354_v13, %v1113_v12  ;;  %v1089_v19 = vld [vmem:[#allocation5] sm:$0xf]  ;;  %v1349_v20 = vld [vmem:[#allocation5 + $0xc] sm:$0xf0]  ;;  %v1347_v21 = vld [vmem:[#allocation5 + $0x4] sm:$0xf]  ;;  %v1118_v22 = vor.u32 %v1352_v14, %v1115_v15 }
  0x41   : > { %557 = vmatpush.bf16.msra.mxu1 %v1142_v57  ;;  %v1091_v23 = vld [vmem:[#allocation5 + $0x10] sm:$0xf0]  ;;  %v1097_v24 = vld [vmem:[#allocation5 + $0x8] sm:$0xf]  ;;  %v1350_v25 = vld [vmem:[#allocation5 + $0x14] sm:$0xf0]  ;;  %v1090_v28 = vor.u32 %v1349_v20, %v1089_v19 }
  0x42   : > { %570 = vmatpush.bf16.msra.mxu2 %v1146_v58  ;;  %583 = vmatpush.bf16.msra.mxu3 %v1150_v62  ;;  %v1348_v26 = vld [vmem:[#allocation5 + $0xc] sm:$0xf]  ;;  %v1099_v27 = vld [vmem:[#allocation5 + $0x18] sm:$0xf0]  ;;  %v1094_v29 = vor.u32 %v1347_v21, %v1091_v23  ;;  %v1098_v30 = vor.u32 %v1350_v25, %v1097_v24  ;;  %v1385_v35 = vld [vmem:[#allocation8 + $0x30] sm:$0xff]  ;;  %s1086_s25 = sshll.u32 %s1879_s11, 3 }
  0x43   : > { %v1102_v31 = vor.u32 %v1348_v26, %v1099_v27  ;;  %v1386_v32 = vld [vmem:[#allocation8 + $0x38] sm:$0xff]  ;;  %v1393_v36 = vld [vmem:[#allocation8 + $0x70] sm:$0xff]  ;;  %v1384_v39 = vld [vmem:[#allocation8 + $0x28] sm:$0xff]  ;;  %s1344_s29 = sshll.u32 %s1719_s21, 3  ;;  %s324_s28 = scalar_lea.vmem [#allocation10], %s1086_s25 }
  0x44   : > { %545 = vmatpush.bf16.msra.mxu0 %v1122_v4  ;;  %v1394_v33 = vld [vmem:[#allocation8 + $0x78] sm:$0xff]  ;;  %v1392_v40 = vld [vmem:[#allocation8 + $0x68] sm:$0xff]  ;;  %v1401_v41 = vld [vmem:[#allocation8 + $0xb0] sm:$0xff]  ;;  %s954_s15 = scalar_lea.hbm %s1945_s5, %s1344_s29  ;;  %s956_s30 = sshll.u32 %s324_s28, 4  ;;  %s957_s30 = int_to_ptr.vmem [resolvable:$true] %s956_s30 }
  0x45   : > { %558 = vmatpush.bf16.msra.mxu1 %v1126_v5  ;;  %v337_v34 = vld [vmem:[%s1883_s16] sm:$0xf]  ;;  %v1383_v43 = vld [vmem:[#allocation8 + $0x20] sm:$0xff]  ;;  %v1400_v45 = vld [vmem:[#allocation8 + $0xa8] sm:$0xff]  ;;  %s958_s6 = sshll.u32 %s954_s15, 4  ;;  %s944_s21 = scalar_lea.sflag [#allocation4], %s1879_s11  ;;  %s959_s6 = int_to_ptr.hbm [resolvable:$true] %s958_s6 }
  0x46   : > { %571 = vmatpush.bf16.msra.mxu2 %v1130_v6  ;;  %584 = vmatpush.bf16.msra.mxu3 %v1134_v10  ;;  %v1402_v37 = vld [vmem:[#allocation8 + $0xb8] sm:$0xff]  ;;  %v1409_v42 = vld [vmem:[#allocation8 + $0xf0] sm:$0xff]  ;;  %v1391_v44 = vld [vmem:[#allocation8 + $0x60] sm:$0xff]  ;;  %s1651_s9 = sshra.s32 %s959_s6, 4  ;;  %s1657_s25 = scalar_lea.hbm %s1945_s5, 16  ;;  %s1652_s9 = int_to_ptr.hbm [resolvable:$true] %s1651_s9 }
  0x47   : > { %v1410_v38 = vld [vmem:[#allocation8 + $0xf8] sm:$0xff]  ;;  %v1408_v46 = vld [vmem:[#allocation8 + $0xe8] sm:$0xff]  ;;  %v1399_v49 = vld [vmem:[#allocation8 + $0xa0] sm:$0xff]  ;;  %s1653_s26 = scalar_lea.hbm %s1652_s9, 8  ;;  %p1658_p10 = scmp.lt.s32.totalorder %s1652_s9, %s1945_s5 }
  0x48   : > { %546 = vmatpush.bf16.msra.mxu0 %v1106_v16  ;;  %v1382_v47 = vld [vmem:[#allocation8 + $0x18] sm:$0xff]  ;;  %v1407_v50 = vld [vmem:[#allocation8 + $0xe0] sm:$0xff]  ;;  %v1381_v51 = vld [vmem:[#allocation8 + $0x10] sm:$0xff]  ;;  %p1654_p1 = scmp.ne.s32.totalorder %s1652_s9, %s1653_s26  ;;  %p1659_p11 = scmp.lt.s32.totalorder %s1657_s25, %s1653_s26 }
  0x49   : > { %559 = vmatpush.bf16.msra.mxu1 %v1110_v17  ;;  %v1390_v48 = vld [vmem:[#allocation8 + $0x58] sm:$0xff]  ;;  %v1389_v52 = vld [vmem:[#allocation8 + $0x50] sm:$0xff]  ;;  %v1380_v55 = vld [vmem:[#allocation8 + $0x8] sm:$0xff] }
  0x4a   : > { %572 = vmatpush.bf16.msra.mxu2 %v1114_v18  ;;  %585 = vmatpush.bf16.msra.mxu3 %v1118_v22  ;;  %v1398_v53 = vld [vmem:[#allocation8 + $0x98] sm:$0xff]  ;;  %v1388_v56 = vld [vmem:[#allocation8 + $0x48] sm:$0xff]  ;;  %v1397_v57 = vld [vmem:[#allocation8 + $0x90] sm:$0xff]  ;;  %p1655_p3 = pnand %p1654_p1, %p1857_p4  ;;  %p1660_p12 = por %p1659_p11, %p1658_p10 }
  0x4b   : > { %v1406_v54 = vld [vmem:[#allocation8 + $0xd8] sm:$0xff]  ;;  %v1405_v58 = vld [vmem:[#allocation8 + $0xd0] sm:$0xff]  ;;  %v1379_v59 = vld [vmem:[#allocation8] sm:$0xff] }
  0x4c   : > { %547 = vmatpush.bf16.msra.mxu0 %v1090_v28  ;;  %v1387_v60 = vld [vmem:[#allocation8 + $0x40] sm:$0xff]  ;;  %v1396_v61 = vld [vmem:[#allocation8 + $0x88] sm:$0xff]  ;;  %v370_v63 = vld [vmem:[#allocation7] sm:$0xf]  ;;  %p1656_p9 = pneg %p1655_p3 }
  0x4d   : > { %560 = vmatpush.bf16.msra.mxu1 %v1094_v29  ;;  %v1404_v62 = vld [vmem:[#allocation8 + $0xc8] sm:$0xff]  ;;  %v1395_v0 = vld [vmem:[#allocation8 + $0x80] sm:$0xff]  ;;  %v372_v2 = vperm.slane %v370_v63, 0  ;;  %v373_v3 = vperm.slane %v370_v63, 1  ;;  %v374_v10 = vperm.slane %v370_v63, 2  ;;  %v375_v12 = vperm.slane %v370_v63, 3 }
  0x4e   : > { %573 = vmatpush.bf16.msra.mxu2 %v1098_v30  ;;  %586 = vmatpush.bf16.msra.mxu3 %v1102_v31  ;;  %v1403_v1 = vld [vmem:[#allocation8 + $0xc0] sm:$0xff]  ;;  %p1661_p13 = pnand %p1660_p12, %p1656_p9 }
  0x4f   : > { %548 = vmatmul.bf16.vlgmr.msra.gmra.mxu0 %v337_v34 }
  0x50   : > { %889 = vmatpush.bf16.msrb.mxu0 %v1386_v32  ;;  %561 = vmatmul.bf16.vlgmr.msra.gmra.mxu1 %v337_v34 }
  0x51   : > { %902 = vmatpush.bf16.msrb.mxu1 %v1394_v33  ;;  %574 = vmatmul.bf16.vlgmr.msra.gmra.mxu2 %v337_v34 }
  0x52   : > { %587 = vmatmul.bf16.vlgmr.msra.gmra.mxu3 %v337_v34  ;;  %915 = vmatpush.bf16.msrb.mxu2 %v1402_v37 }
  0x53   : > { %928 = vmatpush.bf16.msrb.mxu3 %v1410_v38 }
  0x54   : > { %890 = vmatpush.bf16.msrb.mxu0 %v1385_v35 }
  0x55   : > { %903 = vmatpush.bf16.msrb.mxu1 %v1393_v36 }
  0x56   : > { %916 = vmatpush.bf16.msrb.mxu2 %v1401_v41 }
  0x57   : > { %929 = vmatpush.bf16.msrb.mxu3 %v1409_v42 }
  0x58   : > { %891 = vmatpush.bf16.msrb.mxu0 %v1384_v39 }
  0x59   : > { %904 = vmatpush.bf16.msrb.mxu1 %v1392_v40 }
  0x5a   : > { %917 = vmatpush.bf16.msrb.mxu2 %v1400_v45 }
  0x5b   : > { %930 = vmatpush.bf16.msrb.mxu3 %v1408_v46 }
  0x5c   : > { %892 = vmatpush.bf16.msrb.mxu0 %v1383_v43 }
  0x5d   : > { %905 = vmatpush.bf16.msrb.mxu1 %v1391_v44 }
  0x5e   : > { %918 = vmatpush.bf16.msrb.mxu2 %v1399_v49 }
  0x5f   : > { %931 = vmatpush.bf16.msrb.mxu3 %v1407_v50 }
  0x60   : > { %893 = vmatpush.bf16.msrb.mxu0 %v1382_v47 }
  0x61   : > { %906 = vmatpush.bf16.msrb.mxu1 %v1390_v48 }
  0x62   : > { %919 = vmatpush.bf16.msrb.mxu2 %v1398_v53 }
  0x63   : > { %932 = vmatpush.bf16.msrb.mxu3 %v1406_v54 }
  0x64   : > { %894 = vmatpush.bf16.msrb.mxu0 %v1381_v51 }
  0x65   : > { %907 = vmatpush.bf16.msrb.mxu1 %v1389_v52 }
  0x66   : > { %920 = vmatpush.bf16.msrb.mxu2 %v1397_v57 }
  0x67   : > { %933 = vmatpush.bf16.msrb.mxu3 %v1405_v58 }
  0x68   : > { %895 = vmatpush.bf16.msrb.mxu0 %v1380_v55 }
  0x69   : > { %908 = vmatpush.bf16.msrb.mxu1 %v1388_v56 }
  0x6a   : > { %921 = vmatpush.bf16.msrb.mxu2 %v1396_v61 }
  0x6b   : > { %934 = vmatpush.bf16.msrb.mxu3 %v1404_v62 }
  0x6c   : > { %896 = vmatpush.bf16.msrb.mxu0 %v1379_v59 }
  0x6d   : > { %909 = vmatpush.bf16.msrb.mxu1 %v1387_v60 }
  0x6e   : > { %922 = vmatpush.bf16.msrb.mxu2 %v1395_v0 }
  0x6f   : > { %935 = vmatpush.bf16.msrb.mxu3 %v1403_v1  ;;  %v1508_v1 = vld [vmem:[%s1944_s4] ss:$0 sm:$0xff] }
  0xcc   : > { %v549_v4 = vpop.f32.mrf.mxu0 }
  0xcd   : > { %v550_v5 = vadd.f32 %v549_v4, %v372_v2  ;;  %v562_v6 = vpop.f32.mrf.mxu1 }
  0xce   : > { %v563_v7 = vadd.f32 %v562_v6, %v373_v3 }
  0xcf   : > { %v596_v8 = vmul.f32 %v550_v5, %v550_v5  ;;  %v592_v40 = vmul.f32 0.5, %v550_v5 }
  0xd0   : > { %v597_v9 = vmul.f32 %v563_v7, %v563_v7  ;;  %v593_v42 = vmul.f32 0.5, %v563_v7 }
  0xd1   : > { %v600_v11 = vmul.f32 %v596_v8, %v550_v5 }
  0xd2   : > { %v601_v13 = vmul.f32 %v597_v9, %v563_v7 }
  0xd3   : > { %v604_v14 = vmul.f32 0.044715, %v600_v11 }
  0xd4   : > { %v575_v15 = vpop.f32.mrf.mxu2  ;;  %v605_v16 = vmul.f32 0.044715, %v601_v13  ;;  %v551_v19 = vpop.f32.mrf.mxu0 }
  0xd5   : > { %v576_v17 = vadd.f32 %v575_v15, %v374_v10  ;;  %v588_v18 = vpop.f32.mrf.mxu3  ;;  %v608_v20 = vadd.f32 %v604_v14, %v550_v5  ;;  %v564_v22 = vpop.f32.mrf.mxu1 }
  0xd6   : > { %v589_v21 = vadd.f32 %v588_v18, %v375_v12  ;;  %v609_v23 = vadd.f32 %v605_v16, %v563_v7 }
  0xd7   : > { %v598_v24 = vmul.f32 %v576_v17, %v576_v17  ;;  %v612_v26 = vmul.f32 0.7978846, %v608_v20  ;;  %v594_v50 = vmul.f32 0.5, %v576_v17 }
  0xd8   : > { %v599_v25 = vmul.f32 %v589_v21, %v589_v21  ;;  %v613_v28 = vmul.f32 0.7978846, %v609_v23  ;;  %v595_v52 = vmul.f32 0.5, %v589_v21 }
  0xd9   : > { %v602_v27 = vmul.f32 %v598_v24, %v576_v17  ;;  %1509 = vtanh.f32 %v612_v26 }
  0xda   : > { %v603_v29 = vmul.f32 %v599_v25, %v589_v21  ;;  %1511 = vtanh.f32 %v613_v28 }
  0xdb   : > { %v606_v30 = vmul.f32 0.044715, %v602_v27 }
  0xdc   : > { %v607_v31 = vmul.f32 0.044715, %v603_v29  ;;  %v577_v32 = vpop.f32.mrf.mxu2 }
  0xdd   : > { %v610_v33 = vadd.f32 %v606_v30, %v576_v17  ;;  %v590_v34 = vpop.f32.mrf.mxu3 }
  0xde   : > { %v611_v35 = vadd.f32 %v607_v31, %v589_v21 }
  0xdf   : > { %v614_v36 = vmul.f32 0.7978846, %v610_v33  ;;  %v1510_v37 = vpop.eup %1509 }
  0xe0   : > { %v615_v38 = vmul.f32 0.7978846, %v611_v35  ;;  %v1512_v39 = vpop.eup %1511  ;;  %v620_v41 = vadd.f32 1.0, %v1510_v37 }
  0xe1   : > { %1513 = vtanh.f32 %v614_v36  ;;  %v621_v43 = vadd.f32 1.0, %v1512_v39 }
  0xe2   : > { %1515 = vtanh.f32 %v615_v38  ;;  %v624_v44 = vmul.f32 %v620_v41, %v592_v40 }
  0xe3   : > { %v625_v45 = vmul.f32 %v621_v43, %v593_v42 }
  0xe4   : > { %v629_v46 = vpack.c.bf16 %v624_v44, %v624_v44 }
  0xe5   : > { %v630_v47 = vpack.c.bf16 %v625_v45, %v625_v45 }
  0xe6   : > { %897 = vmatmul.bf16.vlgmr.msrb.gmra.mxu0 %v629_v46 }
  0xe7   : > { %v1514_v48 = vpop.eup %1513  ;;  %910 = vmatmul.bf16.vlgmr.msrb.gmra.mxu1 %v630_v47 }
  0xe8   : > { %v1516_v49 = vpop.eup %1515  ;;  %v622_v51 = vadd.f32 1.0, %v1514_v48 }
  0xe9   : > { %v623_v53 = vadd.f32 1.0, %v1516_v49 }
  0xea   : > { %v626_v54 = vmul.f32 %v622_v51, %v594_v50 }
  0xeb   : > { %v627_v55 = vmul.f32 %v623_v53, %v595_v52 }
  0xec   : > { %v631_v56 = vpack.c.bf16 %v626_v54, %v626_v54 }
  0xed   : > { %v632_v57 = vpack.c.bf16 %v627_v55, %v627_v55 }
  0xee   : > { %923 = vmatmul.bf16.vlgmr.msrb.gmra.mxu2 %v631_v56 }
  0xef   : > { %936 = vmatmul.bf16.vlgmr.msrb.gmra.mxu3 %v632_v57 }
 0x163   : > { %v898_v58 = vpop.f32.mrf.mxu0 }
 0x164   : > { %v911_v59 = vpop.f32.mrf.mxu1 }
 0x165   : > { %v912_v62 = vadd.f32 %v911_v59, %v898_v58 }
 0x16b   : > { %v900_v60 = vpop.f32.mrf.mxu0 }
 0x16c   : > { %v913_v61 = vpop.f32.mrf.mxu1 }
 0x171   : > { %v924_v63 = vpop.f32.mrf.mxu2 }
 0x172   : > { %v925_v0 = vadd.f32 %v924_v63, %v912_v62  ;;  %v937_v2 = vpop.f32.mrf.mxu3 }
 0x174   : > { %v938_v3 = vadd.f32 %v937_v2, %v925_v0 }
 0x176   : > { %v941_v4 = vadd.f32 %v1508_v1, %v938_v3 }
 0x178   : > { %942 = vst [vmem:[%s324_s28] sm:$0xff] %v941_v4 }
 0x179   : > { %v926_v5 = vpop.f32.mrf.mxu2 }
 0x17a   : > { %1664 = shalt.err (!%p1661_p13)
}
 0x17b   : > { %1425 = dma.vmem_to_hbm [thread:$0]  (%p1857_p4), %s957_s30, 128, %s959_s6, %s944_s21   ;;  %v939_v6 = vpop.f32.mrf.mxu3 }
 0x17c PF: > { %s970_s11 = sand.u32 1, %s1707_s18   ;;  %p1442_p0 = pnand %p1078_p6, %p1865_p7 }
 0x17d   : > { %s971_s7 = scalar_lea.sflag [#allocation4], %s970_s11 }
 0x17e   : > { %p1443_p2 = pneg %p1442_p0 }
 0x180   : > { %1702 = dma.done.wait (%p1443_p2), %s971_s7, 128  }
 0x181   : > { %1704 = vsyncadd (%p1443_p2), %s971_s7, 4294967168  ;;  %s23_s23 = sadd.s32 1, %s1727_s23   ;;  %s1953_s18 = smov %s1711_s19 }
 0x182   : > { %p20_p5 = scmp.ge.s32.totalorder %s23_s23, 4   ;;  %s1954_s19 = smov %s1715_s20 }
 0x183   : > { %s1955_s20 = smov %s1863_s13  ;;  %s1956_s21 = smov %s1723_s22 }
 0x184   : > { %s1957_s22 = smov %s1959_s8  ;;  %22 = sbr.rel (!%p20_p5) target bundleno = 8 (0x8), region = 104 }
 0x189   :  { %977 = vsyncpa [#allocation3], 1 }
 0x18a   :  { %979 = vsyncpa [#allocation3 + $0x1], 1 }
 0x18b   :  { %980 = vsyncpa [#allocation6], 1 }
 0x18c   :  { %981 = vsyncpa [#allocation9], 1 }
 0x18d   :  { %982 = vsyncpa [#allocation4], 1 }
 0x18e   :  { %984 = vsyncpa [#allocation4 + $0x1], 1 }

</bundles_post_ra>
